<compile_context>
chip_gen: v7x
topology: tpu7x:2x2x1
jax: 0.10.0
libtpu: 0.0.40
codegen_flags: <defaults>
</compile_context>

<pallas_src>
import jax
import jax.numpy as jnp
from jax.experimental import pallas as pl
from jax.experimental.pallas import tpu as pltpu


def mlp_kernel(x_ref, w1_ref, b1_ref, w2_ref, b2_ref, o_ref):
    # Layer 1 on the MXU: (TB, D) @ (D, Hp) -> (TB, Hp), f32 accumulation.
    h = jnp.dot(x_ref[...], w1_ref[...], preferred_element_type=jnp.float32)
    # Bias + ReLU on the VPU (padded hidden lanes stay exactly zero).
    h = jnp.maximum(h + b1_ref[...], 0.0)
    # Layer 2 (out_features == 1): VPU multiply + lane reduction instead of a
    # nearly empty N=1 MXU matmul.
    col = jnp.sum(h * w2_ref[...], axis=-1)          # (TB,)
    col = col + b2_ref[0, 0]                          # scalar bias from SMEM
    # Lane-dense store: batch lives on the lane axis of the (1, TB) output.
    o_ref[...] = col[None, :].astype(o_ref.dtype)


def _round_up(n, m):
    return ((n + m - 1) // m) * m


def neural_net_forward(x, w1, b1, w2, b2, *, tb=2048, use_bf16=False):
    """Fused l2(relu(l1(x))).

    x:  [B, D] f32
    w1: [D, H] f32 (transpose of torch's [H, D])
    b1: [H]    f32
    w2: [H, 1] f32 (transpose of torch's [1, H])
    b2: [1]    f32
    returns [B, 1] f32
    """
    B, D = x.shape
    H = w1.shape[1]

    # Pad only the (tiny) hidden dim of the weights to full 128-lane vregs.
    # Zero padding is exact: padded w1 cols & b1 entries are 0 -> ReLU keeps
    # them 0 -> padded w2 rows are 0 so they contribute nothing to the output.
    Hp = _round_up(H, 128)
    if Hp != H:
        w1 = jnp.pad(w1, ((0, 0), (0, Hp - H)))
        b1 = jnp.pad(b1, (0, Hp - H))
        w2 = jnp.pad(w2, ((0, Hp - H), (0, 0)))

    # Batch tiling: single full-extent block for small batches; otherwise
    # lane-aligned tiles capped so the 'parallel' grid has >= 2 blocks
    # (v7x megacore). No batch padding: the last block may be partial.
    if B <= min(tb, 512):
        TB = B
    else:
        TB = min(tb, _round_up(-(-B // 2), 256))
    grid = (pl.cdiv(B, TB),)

    if use_bf16:
        # Halves dominant x HBM traffic; MXU still accumulates in f32.
        x = x.astype(jnp.bfloat16)
        w1 = w1.astype(jnp.bfloat16)

    b1_row = b1.reshape(1, Hp)
    w2_row = w2.reshape(1, Hp)
    b2_s = b2.reshape(1, 1)

    cost = pl.CostEstimate(
        flops=2 * B * D * Hp + 4 * B * Hp,
        transcendentals=0,
        bytes_accessed=(x.size * x.dtype.itemsize
                        + w1.size * w1.dtype.itemsize
                        + 4 * (2 * Hp + 1 + B)),
    )

    out = pl.pallas_call(
        mlp_kernel,
        out_shape=jax.ShapeDtypeStruct((1, B), jnp.float32),
        grid=grid,
        in_specs=[
            pl.BlockSpec((TB, D), lambda i: (i, 0)),             # x tile (D unpadded)
            pl.BlockSpec((D, Hp), lambda i: (0, 0)),             # w1 (VMEM-resident)
            pl.BlockSpec((1, Hp), lambda i: (0, 0)),             # b1 (resident)
            pl.BlockSpec((1, Hp), lambda i: (0, 0)),             # w2 row (resident)
            pl.BlockSpec(memory_space=pltpu.MemorySpace.SMEM),   # b2 scalar
        ],
        out_specs=pl.BlockSpec((1, TB), lambda i: (0, i)),
        compiler_params=pltpu.CompilerParams(
            dimension_semantics=("parallel",),
        ),
        cost_estimate=cost,
    )(x, w1, b1_row, w2_row, b2_s)

    # Lane-dense (1, B) -> module's (B, 1) convention.
    return out[0].reshape(B, 1)


def init_params(key, input_size, hidden_size):
    """Deterministic init mimicking nn.Linear's U(-1/sqrt(fan_in), 1/sqrt(fan_in))."""
    k1, k2, k3, k4 = jax.random.split(key, 4)
    bound1 = 1.0 / jnp.sqrt(jnp.float32(input_size))
    bound2 = 1.0 / jnp.sqrt(jnp.float32(hidden_size))
    # Stored directly in [in, out] layout (transpose of torch's [out, in]).
    w1 = jax.random.uniform(k1, (input_size, hidden_size), jnp.float32, -bound1, bound1)
    b1 = jax.random.uniform(k2, (hidden_size,), jnp.float32, -bound1, bound1)
    w2 = jax.random.uniform(k3, (hidden_size, 1), jnp.float32, -bound2, bound2)
    b2 = jax.random.uniform(k4, (1,), jnp.float32, -bound2, bound2)
    return w1, b1, w2, b2


if __name__ == "__main__":
    # The CSV-derived input_size is unknown at script time; pick a small,
    # self-consistent feature width. hidden_size = 100 as in the module.
    batch, input_size, hidden_size = 8, 32, 100

    key = jax.random.PRNGKey(0)
    kx, kp = jax.random.split(key)
    x = jax.random.normal(kx, (batch, input_size), jnp.float32)
    w1, b1, w2, b2 = init_params(kp, input_size, hidden_size)

    # Small-batch path (single full-extent block).
    out = jax.block_until_ready(neural_net_forward(x, w1, b1, w2, b2))
    ref = jnp.maximum(x @ w1 + b1, 0.0) @ w2 + b2
    assert out.shape == (batch, 1)
    assert jnp.allclose(out, ref, atol=1e-5, rtol=1e-5)

    # Multi-block path with a partial (unpadded) last block, still small.
    B2 = 300
    x2 = jax.random.normal(jax.random.PRNGKey(1), (B2, input_size), jnp.float32)
    out2 = jax.block_until_ready(neural_net_forward(x2, w1, b1, w2, b2, tb=128))
    ref2 = jnp.maximum(x2 @ w1 + b1, 0.0) @ w2 + b2
    assert out2.shape == (B2, 1)
    assert jnp.allclose(out2, ref2, atol=1e-5, rtol=1e-5)

    print("KERNEL_OK")
</pallas_src>

<mosaic_0001>
module attributes {stable_mosaic.version = 11 : i64} {
  func.func @mlp_kernel(%arg0: i32, %arg1: memref<8x32xf32, #tpu.memory_space<vmem>>, %arg2: memref<32x128xf32, #tpu.memory_space<vmem>>, %arg3: memref<1x128xf32, #tpu.memory_space<vmem>>, %arg4: memref<1x128xf32, #tpu.memory_space<vmem>>, %arg5: memref<1x1xf32, #tpu.memory_space<smem>>, %arg6: memref<1x8xf32, #tpu.memory_space<vmem>>) attributes {dimension_semantics = [#tpu.dimension_semantics<parallel>], iteration_bounds = array<i64: 1>, scalar_prefetch = 0 : i64, scratch_operands = 0 : i64, tpu.core_type = #tpu.core_type<tc>, window_params = [{transform_indices = @transform_0, window_bounds = array<i64: 8, 32>}, {pipeline_mode = #tpu.pipeline_mode<synchronous>, transform_indices = @transform_1, window_bounds = array<i64: 32, 128>}, {pipeline_mode = #tpu.pipeline_mode<synchronous>, transform_indices = @transform_2, window_bounds = array<i64: 1, 128>}, {pipeline_mode = #tpu.pipeline_mode<synchronous>, transform_indices = @transform_3, window_bounds = array<i64: 1, 128>}, {transform_indices = @transform_4, window_bounds = array<i64: 1, 1>}, {transform_indices = @transform_5, window_bounds = array<i64: 1, 8>}]} {
    %c0 = arith.constant 0 : index
    %c0_0 = arith.constant 0 : index
    %0 = vector.load %arg1[%c0, %c0_0] : memref<8x32xf32, #tpu.memory_space<vmem>>, vector<8x32xf32>
    %c0_1 = arith.constant 0 : index
    %c0_2 = arith.constant 0 : index
    %1 = vector.load %arg2[%c0_1, %c0_2] : memref<32x128xf32, #tpu.memory_space<vmem>>, vector<32x128xf32>
    %cst = arith.constant dense<0.000000e+00> : vector<8x128xf32>
    %2 = tpu.matmul %0, %1, %cst {dimension_numbers = #tpu.dot_dimension_numbers<[1], [0], [0], [1], [0, 0, 1, 1], [], []>} : vector<8x32xf32>, vector<32x128xf32>, vector<8x128xf32> -> vector<8x128xf32>
    %c0_3 = arith.constant 0 : index
    %c0_4 = arith.constant 0 : index
    %3 = vector.load %arg3[%c0_3, %c0_4] : memref<1x128xf32, #tpu.memory_space<vmem>>, vector<1x128xf32>
    %4 = vector.broadcast %3 : vector<1x128xf32> to vector<8x128xf32>
    %5 = arith.addf %2, %4 : vector<8x128xf32>
    %cst_5 = arith.constant 0.000000e+00 : f32
    %6 = vector.broadcast %cst_5 : f32 to vector<8x128xf32>
    %7 = arith.maximumf %5, %6 : vector<8x128xf32>
    %c0_6 = arith.constant 0 : index
    %c0_7 = arith.constant 0 : index
    %8 = vector.load %arg4[%c0_6, %c0_7] : memref<1x128xf32, #tpu.memory_space<vmem>>, vector<1x128xf32>
    %9 = vector.broadcast %8 : vector<1x128xf32> to vector<8x128xf32>
    %10 = arith.mulf %7, %9 : vector<8x128xf32>
    %cst_8 = arith.constant dense<0.000000e+00> : vector<8xf32>
    %11 = vector.multi_reduction <add>, %10, %cst_8 [1] : vector<8x128xf32> to vector<8xf32>
    %c0_9 = arith.constant 0 : index
    %c0_10 = arith.constant 0 : index
    %12 = memref.load %arg5[%c0_9, %c0_10] : memref<1x1xf32, #tpu.memory_space<smem>>
    %13 = vector.broadcast %12 : f32 to vector<8xf32>
    %14 = arith.addf %11, %13 : vector<8xf32>
    %15 = vector.shape_cast %14 : vector<8xf32> to vector<1x8xf32>
    %c0_11 = arith.constant 0 : index
    %c0_12 = arith.constant 0 : index
    %16 = vector.load %arg6[%c0_11, %c0_12] : memref<1x8xf32, #tpu.memory_space<vmem>>, vector<1x8xf32>
    tpu.vector_store %arg6[%c0_11, %c0_12], %15 {strides = array<i32>} : memref<1x8xf32, #tpu.memory_space<vmem>>, vector<1x8xf32>,
    return
  }
  func.func @transform_0(%arg0: i32) -> (i32, i32) {
    %c0_i32 = arith.constant 0 : i32
    %c0_i32_0 = arith.constant 0 : i32
    return %arg0, %c0_i32 : i32, i32
  }
  func.func @transform_1(%arg0: i32) -> (i32, i32) {
    %c0_i32 = arith.constant 0 : i32
    %c0_i32_0 = arith.constant 0 : i32
    %c0_i32_1 = arith.constant 0 : i32
    return %c0_i32, %c0_i32_0 : i32, i32
  }
  func.func @transform_2(%arg0: i32) -> (i32, i32) {
    %c0_i32 = arith.constant 0 : i32
    %c0_i32_0 = arith.constant 0 : i32
    %c0_i32_1 = arith.constant 0 : i32
    return %c0_i32, %c0_i32_0 : i32, i32
  }
  func.func @transform_3(%arg0: i32) -> (i32, i32) {
    %c0_i32 = arith.constant 0 : i32
    %c0_i32_0 = arith.constant 0 : i32
    %c0_i32_1 = arith.constant 0 : i32
    return %c0_i32, %c0_i32_0 : i32, i32
  }
  func.func @transform_4(%arg0: i32) -> (i32, i32) {
    %c0_i32 = arith.constant 0 : i32
    %c0_i32_0 = arith.constant 0 : i32
    %c0_i32_1 = arith.constant 0 : i32
    return %c0_i32, %c0_i32_0 : i32, i32
  }
  func.func @transform_5(%arg0: i32) -> (i32, i32) {
    %c0_i32 = arith.constant 0 : i32
    %c0_i32_0 = arith.constant 0 : i32
    return %c0_i32, %arg0 : i32, i32
  }
}

</mosaic_0001>

<bundles_post_ra>
// kernel: tpu_custom_call.1
= control target key start
LH: loop header
LB: loop body
LE: loop exit
PB: predicated region body
PF: predicated region fallthrough
CT: control target
= control target key end

     0   :  { %11 = vsyncpa [#allocation4], 0  ;;  %s369_s0 = inlined_call_operand.hbm [shape: f32[8,32], index: 0, kind: input, shape index: {}]   ;;  %s370_s1 = inlined_call_operand.hbm [shape: f32[32,128], index: 1, kind: input, shape index: {}]   ;;  %s371_s2 = inlined_call_operand.vmem [shape: f32[1,128], index: 2, kind: input, shape index: {}]   ;;  %s372_s3 = inlined_call_operand.vmem [shape: f32[1,128], index: 3, kind: input, shape index: {}]   ;;  %s373_s4 = inlined_call_operand.<no memory space> [shape: f32[1,1], index: 4, kind: input, shape index: {}]   ;;  %s374_s5 = inlined_call_operand.hbm [shape: f32[1,8], index: 5, kind: output, shape index: {}]  }
   0x1   :  { %12 = vsyncpa [#allocation7], 0 }
   0x2   :  { %13 = vsyncpa [#allocation5], 0  ;;  %s279_s18 = smov [#allocation3]   ;;  %s280_s20 = smov [#allocation6]  }
   0x3   :  { %s20_s19 = sshll.u32 %s279_s18, 4  ;;  %s29_s21 = sshll.u32 %s280_s20, 4  ;;  %s21_s19 = int_to_ptr.vmem [resolvable:$true] %s20_s19  ;;  %s317_s21 = int_to_ptr.vmem [resolvable:$true] %s29_s21 }
   0x4   :  { %s207_s24 = scalar_lea.hbm %s369_s0, 128 }
   0x5   :  { %p208_p0 = scmp.ne.s32.totalorder %s369_s0, %s207_s24  ;;  %p211_p1 = scmp.lt.u32.totalorder %s207_s24, %s369_s0 }
   0x7   :  { %p213_p2 = pnand %p211_p1, %p208_p0 }
   0x9   :  { %216 = shalt.err (!%p213_p2)
}
   0xa   :  { %s217_s29 = scalar_lea.vmem %s21_s19, 128  ;;  %p222_p4 = scmp.lt.s32.totalorder %s21_s19, %s21_s19 }
   0xb   :  { %p218_p3 = scmp.ne.s32.totalorder %s21_s19, %s217_s29  ;;  %p223_p5 = scmp.lt.s32.totalorder %s217_s29, %s217_s29 }
   0xd   :  { %p224_p6 = por %p223_p5, %p222_p4 }
   0xf   :  { %p225_p7 = pnand %p224_p6, %p218_p3 }
  0x11   :  { %228 = shalt.err (!%p225_p7)
}
  0x12   :  { %23 = dma.hbm_to_vmem [thread:$0]  %s369_s0, 128, %s21_s19, [#allocation4]  }
  0x13   :  { %s229_s9 = scalar_lea.hbm %s370_s1, 512 }
  0x14   :  { %p230_p8 = scmp.ne.s32.totalorder %s370_s1, %s229_s9  ;;  %p233_p9 = scmp.lt.u32.totalorder %s229_s9, %s370_s1 }
  0x16   :  { %p235_p10 = pnand %p233_p9, %p230_p8 }
  0x18   :  { %238 = shalt.err (!%p235_p10)
}
  0x19   :  { %s239_s14 = scalar_lea.vmem %s317_s21, 512  ;;  %p244_p12 = scmp.lt.s32.totalorder %s317_s21, %s317_s21 }
  0x1a   :  { %p240_p11 = scmp.ne.s32.totalorder %s317_s21, %s239_s14  ;;  %p245_p13 = scmp.lt.s32.totalorder %s239_s14, %s239_s14 }
  0x1c   :  { %p246_p0 = por %p245_p13, %p244_p12 }
  0x1e   :  { %p247_p1 = pnand %p246_p0, %p240_p11 }
  0x20   :  { %250 = shalt.err (!%p247_p1)
}
  0x21   :  { %s281_s0 = smov 128   ;;  %s282_s15 = smov 8  }
  0x22   :  { %35 = dma.hbm_to_vmem [thread:$0]  %s370_s1, 512, %s317_s21, [#allocation7], %s281_s0, %s281_s0, %s282_s15  }
  0x23   :  { %273 = dma.done.wait [#allocation4], 128  }
  0x24   :  { %274 = vsyncadd [#allocation4], 4294967168 }
  0x25   :  { %275 = dma.done.wait [#allocation7], 512  }
  0x26   :  { %276 = vsyncadd [#allocation7], 4294966784  ;;  %v283_v0 = vmov 0.0|0.0   ;;  %vm284_vm0 = vmmov 0   ;;  %v285_v1 = vmov 0.0   ;;  %v49_v2 = vld [vmem:[#allocation6] sm:$0xff]  ;;  %v149_v16 = vlaneseq }
  0x27   :  { %193 = vmatprep.subr.bf16.mxu0 %v283_v0  ;;  %190 = vmatprep.mubr.msk.f32.mxu0 %vm284_vm0, %v285_v1  ;;  %v50_v3 = vld [vmem:[#allocation6 + $0x8] sm:$0xff]  ;;  %v51_v4 = vld [vmem:[#allocation6 + $0x10] sm:$0xff]  ;;  %v52_v6 = vld [vmem:[#allocation6 + $0x18] sm:$0xff]  ;;  %vm60_vm1 = vcmask 261120   ;;  %v146_v19 = vstv %s373_s4  ;;  %vm156_vm2 = vcmask 57344  }
  0x28   :  { %v194_v5 = vpack.c.bf16 %v50_v3, %v49_v2  ;;  %v197_v7 = vpack.c.bf16 %v52_v6, %v51_v4  ;;  %v48_v8 = vld [vmem:[#allocation3] sm:$0xff]  ;;  %v150_v17 = vand.u32 127, %v149_v16  ;;  %v152_v18 = vshrl.u32 %v149_v16, 7 }
  0x29   :  { %v174_v9 = vld [vmem:[%s371_s2] ss:$0 sm:$0xff]  ;;  %s286_s2 = smov [#allocation8]  }
  0x2a   :  { %195 = vmatpush3.bf16.msra.mxu0 %v194_v5  ;;  %v176_v13 = vld [vmem:[%s372_s3] ss:$0 sm:$0xff]  ;;  %v153_v20 = vsub.s32 %v150_v17, %v152_v18  ;;  %s164_s23 = sshll.u32 %s286_s2, 4  ;;  %s165_s23 = int_to_ptr.vmem [resolvable:$true] %s164_s23 }
  0x2b   :  { %196 = vmatprep.subr.bf16.mxu0 %v283_v0  ;;  %s251_s3 = scalar_lea.vmem %s165_s23, 16  ;;  %s255_s24 = scalar_lea.vmem %s165_s23, 32 }
  0x2c   :  { %p252_p2 = scmp.ne.s32.totalorder %s165_s23, %s251_s3  ;;  %p256_p3 = scmp.lt.s32.totalorder %s165_s23, %s165_s23 }
  0x2d   :  { %p257_p4 = scmp.lt.s32.totalorder %s255_s24, %s251_s3 }
  0x2e   :  { %198 = vmatpush3.bf16.msra.mxu0 %v197_v7 }
  0x2f   :  { %p258_p5 = por %p257_p4, %p256_p3 }
  0x31   :  { %191 = vmatmul.mubr.msk.f32.vlgmr.msra.gmra.mrb[0].mxu0 %vm60_vm1, %v48_v8  ;;  %p259_p6 = pnand %p258_p5, %p252_p2 }
 0x104   :  { %v130_v10 = vpop.f32.mrb[0].mxu0 }
 0x105   :  { %v131_v11 = vadd.f32 %v174_v9, %v130_v10  ;;  %v192_v12 = vpop.f32.mrb[1].mxu0 }
 0x107   :  { %v134_v14 = vmax.f32 %v131_v11, 0.0 }
 0x109   :  { %v142_v15 = vmul.f32 %v176_v13, %v134_v14 }
 0x10b   :  { %143 = vadd.xlane.f32.xlu0 %v142_v15 }
 0x198   :  { %v144_v21 = vpop.xlane.xlu0 %143 }
 0x199   :  { %v147_v22 = vadd.f32 %v146_v19, %v144_v21 }
 0x19b   :  { %v154_v23 = vrot.slane %v147_v22, %v153_v20 }
 0x19d   :  { %157 = vst.msk [vmem:[#allocation8] sm:$0x1] %vm156_vm2, %v154_v23 }
 0x19e   :  { %262 = shalt.err (!%p259_p6)
}
 0x19f   :  { %s263_s4 = scalar_lea.hbm %s374_s5, 16 }
 0x1a0   :  { %p264_p7 = scmp.ne.s32.totalorder %s374_s5, %s263_s4  ;;  %p267_p8 = scmp.lt.u32.totalorder %s263_s4, %s374_s5 }
 0x1a2   :  { %p269_p9 = pnand %p267_p8, %p264_p7 }
 0x1a4   :  { %272 = shalt.err (!%p269_p9)
}
 0x1a5   :  { %167 = dma.vmem_to_hbm [thread:$0]  %s165_s23, 16, %s374_s5, [#allocation5]  }
 0x1a6   :  { %277 = dma.done.wait [#allocation5], 16  }
 0x1a7   :  { %278 = vsyncadd [#allocation5], 4294967280 }
 0x1a8   :  { %171 = vsyncpa [#allocation4], 1 }
 0x1a9   :  { %172 = vsyncpa [#allocation7], 1 }
 0x1aa   :  { %173 = vsyncpa [#allocation5], 1 }

</bundles_post_ra>
